<compile_context>
chip_gen: v7x
topology: tpu7x:2x2x1
jax: 0.10.0
libtpu: 0.0.40
codegen_flags: <defaults>
</compile_context>

<pallas_src>
from functools import partial

import jax
import jax.numpy as jnp
import numpy as np
from jax.experimental import pallas as pl
from jax.experimental.pallas import tpu as pltpu

K_IN = 28 * 28          # 784 (already a multiple of 8 sublanes; no lane pad needed)
H1 = 512
H2 = 256
N_CLASSES = 10
N_PAD = 128             # lane-dense padded class dimension
MAX_TILE_B = 1024       # batch tile cap (multiple of 256)


def _round_up(v, m):
    return (v + m - 1) // m * m


def _choose_tile_b(B, max_tile=MAX_TILE_B):
    """Pick the batch tile.

    - tiny batches: round to 16 (bf16 native sublane tile is (16, 128))
    - otherwise: multiple of 256, sized so the grid has >=2 steps when B allows
      (v7x megacore sharding) and so ragged batches don't pad a near-empty tile.
    """
    if B <= 256:
        return _round_up(B, 16)
    n_steps = max(2, pl.cdiv(B, max_tile))
    return _round_up(pl.cdiv(B, n_steps), 256)


def mlp_kernel(x_ref, w1_ref, b1_ref, w2_ref, b2_ref, w3_ref, b3_ref, o_ref):
    # x_ref: (tile_b, 784) bf16; weights bf16; biases f32; o_ref (tile_b, 128) bf16.
    x = x_ref[...]

    h1 = jnp.dot(x, w1_ref[...], preferred_element_type=jnp.float32) + b1_ref[...]
    h1 = jnp.maximum(h1, 0.0).astype(jnp.bfloat16)          # relu(fc1)
    # TODO(synk): nn.Dropout(0.2) is identity in eval mode; training-mode dropout
    # (pltpu.prng_random_bits mask) is intentionally not applied here.

    h2 = jnp.dot(h1, w2_ref[...], preferred_element_type=jnp.float32) + b2_ref[...]
    h2 = jnp.maximum(h2, 0.0).astype(jnp.bfloat16)          # relu(fc2)

    logits = jnp.dot(h2, w3_ref[...], preferred_element_type=jnp.float32) + b3_ref[...]

    # log_softmax over the 128 padded lanes: padded columns carry bias -1e30, so
    # exp underflows to 0 and the result equals log_softmax over the real 10.
    m = jnp.max(logits, axis=-1, keepdims=True)
    shifted = logits - m
    lse = jnp.log(jnp.sum(jnp.exp(shifted), axis=-1, keepdims=True))
    o_ref[...] = (shifted - lse).astype(o_ref.dtype)


def prepare_params(params):
    """Cast / pad logical (f32, unpadded) params into the kernel layout."""
    w1, b1, w2, b2, w3, b3 = params
    w1p = w1.astype(jnp.bfloat16)                                             # (784, 512)
    w2p = w2.astype(jnp.bfloat16)                                             # (512, 256)
    w3p = jnp.pad(w3, ((0, 0), (0, N_PAD - N_CLASSES))).astype(jnp.bfloat16)  # (256, 128)
    b3p = jnp.pad(b3, ((0, 0), (0, N_PAD - N_CLASSES)),
                  constant_values=-1e30).astype(jnp.float32)                  # (1, 128)
    return (w1p, b1.astype(jnp.float32), w2p, b2.astype(jnp.float32), w3p, b3p)


@partial(jax.jit, static_argnames=("max_tile_b",))
def mlp_forward(x_img, kernel_params, max_tile_b=MAX_TILE_B):
    """Forward pass.

    x_img: anything reshapeable to (B, 784) (e.g. (B, 1, 28, 28) f32 NCHW, like
           the torch module's x.view(-1, 784)); passing (B, 784) bf16 skips the
           in-jit cast entirely.
    Returns (B, 10) bf16 log-probs.
    """
    w1, b1, w2, b2, w3, b3 = kernel_params
    x = x_img.reshape(-1, K_IN)                   # same as torch x.view(-1, 784)
    B = x.shape[0]
    if x.dtype != jnp.bfloat16:
        x = x.astype(jnp.bfloat16)

    tile_b = _choose_tile_b(B, max_tile_b)
    b_pad = _round_up(B, tile_b)
    if b_pad != B:
        x = jnp.pad(x, ((0, b_pad - B), (0, 0)))

    grid = (b_pad // tile_b,)
    resident = lambda shape: pl.BlockSpec(shape, lambda i: (0,) * len(shape))

    out = pl.pallas_call(
        mlp_kernel,
        out_shape=jax.ShapeDtypeStruct((b_pad, N_PAD), jnp.bfloat16),
        grid=grid,
        in_specs=[
            pl.BlockSpec((tile_b, K_IN), lambda i: (i, 0)),    # x: tiled over batch
            resident(w1.shape), resident(b1.shape),            # weights/biases stay
            resident(w2.shape), resident(b2.shape),            # VMEM-resident
            resident(w3.shape), resident(b3.shape),
        ],
        out_specs=pl.BlockSpec((tile_b, N_PAD), lambda i: (i, 0)),
        compiler_params=pltpu.CompilerParams(
            dimension_semantics=("parallel",)),
    )(x, w1, b1, w2, b2, w3, b3)
    return out[:B, :N_CLASSES]


def init_params(key):
    """Deterministic init mimicking nn.Linear shapes, stored as (in, out)."""
    def linear(key, fan_in, fan_out):
        kw, kb = jax.random.split(key)
        bound = 1.0 / np.sqrt(fan_in)
        w = jax.random.uniform(kw, (fan_in, fan_out), jnp.float32, -bound, bound)
        b = jax.random.uniform(kb, (1, fan_out), jnp.float32, -bound, bound)
        return w, b

    k1, k2, k3 = jax.random.split(key, 3)
    w1, b1 = linear(k1, K_IN, H1)
    w2, b2 = linear(k2, H1, H2)
    w3, b3 = linear(k3, H2, N_CLASSES)
    return (w1, b1, w2, b2, w3, b3)


def reference_forward(x_img, params):
    """Pure-JAX reference emulating the kernel's bf16-in / f32-accumulate numerics."""
    w1, b1, w2, b2, w3, b3 = params
    bf = jnp.bfloat16
    x = x_img.reshape(-1, K_IN).astype(bf)
    h1 = jnp.maximum(
        jnp.dot(x, w1.astype(bf), preferred_element_type=jnp.float32) + b1, 0.0)
    h2 = jnp.maximum(
        jnp.dot(h1.astype(bf), w2.astype(bf), preferred_element_type=jnp.float32) + b2, 0.0)
    logits = jnp.dot(h2.astype(bf), w3.astype(bf),
                     preferred_element_type=jnp.float32) + b3
    return jax.nn.log_softmax(logits, axis=1)


if __name__ == "__main__":
    key = jax.random.PRNGKey(0)
    kx, kp = jax.random.split(key)

    B = 2
    x = jax.random.normal(kx, (B, 1, 28, 28), jnp.float32)   # NCHW, like PyTorch
    params = init_params(kp)
    kernel_params = prepare_params(params)

    out = mlp_forward(x, kernel_params)
    out = jax.block_until_ready(out)
    assert out.shape == (B, N_CLASSES)

    ref = reference_forward(x, params)
    np.testing.assert_allclose(np.asarray(out, dtype=np.float32),
                               np.asarray(ref, dtype=np.float32),
                               rtol=2e-2, atol=2e-2)

    print("KERNEL_OK")
</pallas_src>

<mosaic_0001>
module attributes {stable_mosaic.version = 11 : i64} {
  func.func @mlp_kernel(%arg0: i32, %arg1: memref<16x784xbf16, #tpu.memory_space<vmem>>, %arg2: memref<784x512xbf16, #tpu.memory_space<vmem>>, %arg3: memref<1x512xf32, #tpu.memory_space<vmem>>, %arg4: memref<512x256xbf16, #tpu.memory_space<vmem>>, %arg5: memref<1x256xf32, #tpu.memory_space<vmem>>, %arg6: memref<256x128xbf16, #tpu.memory_space<vmem>>, %arg7: memref<1x128xf32, #tpu.memory_space<vmem>>, %arg8: memref<16x128xbf16, #tpu.memory_space<vmem>>) attributes {dimension_semantics = [#tpu.dimension_semantics<parallel>], iteration_bounds = array<i64: 1>, scalar_prefetch = 0 : i64, scratch_operands = 0 : i64, tpu.core_type = #tpu.core_type<tc>, window_params = [{transform_indices = @transform_0, window_bounds = array<i64: 16, 784>}, {pipeline_mode = #tpu.pipeline_mode<synchronous>, transform_indices = @transform_1, window_bounds = array<i64: 784, 512>}, {pipeline_mode = #tpu.pipeline_mode<synchronous>, transform_indices = @transform_2, window_bounds = array<i64: 1, 512>}, {pipeline_mode = #tpu.pipeline_mode<synchronous>, transform_indices = @transform_3, window_bounds = array<i64: 512, 256>}, {pipeline_mode = #tpu.pipeline_mode<synchronous>, transform_indices = @transform_4, window_bounds = array<i64: 1, 256>}, {pipeline_mode = #tpu.pipeline_mode<synchronous>, transform_indices = @transform_5, window_bounds = array<i64: 256, 128>}, {pipeline_mode = #tpu.pipeline_mode<synchronous>, transform_indices = @transform_6, window_bounds = array<i64: 1, 128>}, {transform_indices = @transform_7, window_bounds = array<i64: 16, 128>}]} {
    %c0 = arith.constant 0 : index
    %c0_0 = arith.constant 0 : index
    %0 = vector.load %arg1[%c0, %c0_0] : memref<16x784xbf16, #tpu.memory_space<vmem>>, vector<16x784xbf16>
    %c0_1 = arith.constant 0 : index
    %c0_2 = arith.constant 0 : index
    %1 = vector.load %arg2[%c0_1, %c0_2] : memref<784x512xbf16, #tpu.memory_space<vmem>>, vector<784x512xbf16>
    %cst = arith.constant dense<0.000000e+00> : vector<16x512xf32>
    %2 = tpu.matmul %0, %1, %cst {dimension_numbers = #tpu.dot_dimension_numbers<[1], [0], [0], [1], [0, 0, 1, 1], [], []>} : vector<16x784xbf16>, vector<784x512xbf16>, vector<16x512xf32> -> vector<16x512xf32>
    %c0_3 = arith.constant 0 : index
    %c0_4 = arith.constant 0 : index
    %3 = vector.load %arg3[%c0_3, %c0_4] : memref<1x512xf32, #tpu.memory_space<vmem>>, vector<1x512xf32>
    %4 = vector.broadcast %3 : vector<1x512xf32> to vector<16x512xf32>
    %5 = arith.addf %2, %4 : vector<16x512xf32>
    %cst_5 = arith.constant 0.000000e+00 : f32
    %6 = vector.broadcast %cst_5 : f32 to vector<16x512xf32>
    %7 = arith.maximumf %5, %6 : vector<16x512xf32>
    %8 = arith.truncf %7 : vector<16x512xf32> to vector<16x512xbf16>
    %c0_6 = arith.constant 0 : index
    %c0_7 = arith.constant 0 : index
    %9 = vector.load %arg4[%c0_6, %c0_7] : memref<512x256xbf16, #tpu.memory_space<vmem>>, vector<512x256xbf16>
    %cst_8 = arith.constant dense<0.000000e+00> : vector<16x256xf32>
    %10 = tpu.matmul %8, %9, %cst_8 {dimension_numbers = #tpu.dot_dimension_numbers<[1], [0], [0], [1], [0, 0, 1, 1], [], []>} : vector<16x512xbf16>, vector<512x256xbf16>, vector<16x256xf32> -> vector<16x256xf32>
    %c0_9 = arith.constant 0 : index
    %c0_10 = arith.constant 0 : index
    %11 = vector.load %arg5[%c0_9, %c0_10] : memref<1x256xf32, #tpu.memory_space<vmem>>, vector<1x256xf32>
    %12 = vector.broadcast %11 : vector<1x256xf32> to vector<16x256xf32>
    %13 = arith.addf %10, %12 : vector<16x256xf32>
    %cst_11 = arith.constant 0.000000e+00 : f32
    %14 = vector.broadcast %cst_11 : f32 to vector<16x256xf32>
    %15 = arith.maximumf %13, %14 : vector<16x256xf32>
    %16 = arith.truncf %15 : vector<16x256xf32> to vector<16x256xbf16>
    %c0_12 = arith.constant 0 : index
    %c0_13 = arith.constant 0 : index
    %17 = vector.load %arg6[%c0_12, %c0_13] : memref<256x128xbf16, #tpu.memory_space<vmem>>, vector<256x128xbf16>
    %cst_14 = arith.constant dense<0.000000e+00> : vector<16x128xf32>
    %18 = tpu.matmul %16, %17, %cst_14 {dimension_numbers = #tpu.dot_dimension_numbers<[1], [0], [0], [1], [0, 0, 1, 1], [], []>} : vector<16x256xbf16>, vector<256x128xbf16>, vector<16x128xf32> -> vector<16x128xf32>
    %c0_15 = arith.constant 0 : index
    %c0_16 = arith.constant 0 : index
    %19 = vector.load %arg7[%c0_15, %c0_16] : memref<1x128xf32, #tpu.memory_space<vmem>>, vector<1x128xf32>
    %20 = vector.broadcast %19 : vector<1x128xf32> to vector<16x128xf32>
    %21 = arith.addf %18, %20 : vector<16x128xf32>
    %cst_17 = arith.constant dense<0xFF800000> : vector<16xf32>
    %22 = vector.multi_reduction <maximumf>, %21, %cst_17 [1] : vector<16x128xf32> to vector<16xf32>
    %23 = vector.shape_cast %22 : vector<16xf32> to vector<16x1xf32>
    %24 = vector.broadcast %23 : vector<16x1xf32> to vector<16x128xf32>
    %25 = arith.subf %21, %24 : vector<16x128xf32>
    %26 = math.exp %25 : vector<16x128xf32>
    %cst_18 = arith.constant dense<0.000000e+00> : vector<16xf32>
    %27 = vector.multi_reduction <add>, %26, %cst_18 [1] : vector<16x128xf32> to vector<16xf32>
    %28 = vector.shape_cast %27 : vector<16xf32> to vector<16x1xf32>
    %29 = math.log %28 : vector<16x1xf32>
    %30 = vector.broadcast %29 : vector<16x1xf32> to vector<16x128xf32>
    %31 = arith.subf %25, %30 : vector<16x128xf32>
    %32 = arith.truncf %31 : vector<16x128xf32> to vector<16x128xbf16>
    %c0_19 = arith.constant 0 : index
    %c0_20 = arith.constant 0 : index
    %33 = vector.load %arg8[%c0_19, %c0_20] : memref<16x128xbf16, #tpu.memory_space<vmem>>, vector<16x128xbf16>
    tpu.vector_store %arg8[%c0_19, %c0_20], %32 {strides = array<i32>} : memref<16x128xbf16, #tpu.memory_space<vmem>>, vector<16x128xbf16>,
    return
  }
  func.func @transform_0(%arg0: i32) -> (i32, i32) {
    %c0_i32 = arith.constant 0 : i32
    %c0_i32_0 = arith.constant 0 : i32
    return %arg0, %c0_i32 : i32, i32
  }
  func.func @transform_1(%arg0: i32) -> (i32, i32) {
    %c0_i32 = arith.constant 0 : i32
    %c0_i32_0 = arith.constant 0 : i32
    %c0_i32_1 = arith.constant 0 : i32
    return %c0_i32, %c0_i32_0 : i32, i32
  }
  func.func @transform_2(%arg0: i32) -> (i32, i32) {
    %c0_i32 = arith.constant 0 : i32
    %c0_i32_0 = arith.constant 0 : i32
    %c0_i32_1 = arith.constant 0 : i32
    return %c0_i32, %c0_i32_0 : i32, i32
  }
  func.func @transform_3(%arg0: i32) -> (i32, i32) {
    %c0_i32 = arith.constant 0 : i32
    %c0_i32_0 = arith.constant 0 : i32
    %c0_i32_1 = arith.constant 0 : i32
    return %c0_i32, %c0_i32_0 : i32, i32
  }
  func.func @transform_4(%arg0: i32) -> (i32, i32) {
    %c0_i32 = arith.constant 0 : i32
    %c0_i32_0 = arith.constant 0 : i32
    %c0_i32_1 = arith.constant 0 : i32
    return %c0_i32, %c0_i32_0 : i32, i32
  }
  func.func @transform_5(%arg0: i32) -> (i32, i32) {
    %c0_i32 = arith.constant 0 : i32
    %c0_i32_0 = arith.constant 0 : i32
    %c0_i32_1 = arith.constant 0 : i32
    return %c0_i32, %c0_i32_0 : i32, i32
  }
  func.func @transform_6(%arg0: i32) -> (i32, i32) {
    %c0_i32 = arith.constant 0 : i32
    %c0_i32_0 = arith.constant 0 : i32
    %c0_i32_1 = arith.constant 0 : i32
    return %c0_i32, %c0_i32_0 : i32, i32
  }
  func.func @transform_7(%arg0: i32) -> (i32, i32) {
    %c0_i32 = arith.constant 0 : i32
    %c0_i32_0 = arith.constant 0 : i32
    return %arg0, %c0_i32 : i32, i32
  }
}

</mosaic_0001>

<bundles_post_ra>
// kernel: mlp_forward.1
= control target key start
LH: loop header
LB: loop body
LE: loop exit
PB: predicated region body
PF: predicated region fallthrough
CT: control target
= control target key end

     0   :  { %12 = vsyncpa [#allocation3], 0  ;;  %s3396_s0 = inlined_call_operand.vmem [shape: bf16[16,784], index: 0, kind: input, shape index: {}]   ;;  %s3397_s1 = inlined_call_operand.hbm [shape: bf16[784,512], index: 1, kind: input, shape index: {}]   ;;  %s3398_s2 = inlined_call_operand.vmem [shape: f32[1,512], index: 2, kind: input, shape index: {}]   ;;  %s3399_s3 = inlined_call_operand.hbm [shape: bf16[512,256], index: 3, kind: input, shape index: {}]   ;;  %s3400_s4 = inlined_call_operand.vmem [shape: f32[1,256], index: 4, kind: input, shape index: {}]   ;;  %s3401_s5 = inlined_call_operand.vmem [shape: bf16[256,128], index: 5, kind: input, shape index: {}]   ;;  %s3402_s6 = inlined_call_operand.vmem [shape: f32[1,128], index: 6, kind: input, shape index: {}]   ;;  %s3403_s7 = inlined_call_operand.vmem [shape: bf16[16,128], index: 7, kind: output, shape index: {}]  }
   0x1   :  { %13 = vsyncpa [#allocation5], 0  ;;  %s3192_s24 = smov [#allocation2]   ;;  %s3144_s28 = scalar_lea.hbm %s3397_s1, 25088 }
   0x2   :  { %s21_s25 = sshll.u32 %s3192_s24, 4  ;;  %p3145_p0 = scmp.ne.s32.totalorder %s3397_s1, %s3144_s28  ;;  %s22_s25 = int_to_ptr.vmem [resolvable:$true] %s21_s25 }
   0x3   :  { %p3148_p1 = scmp.lt.u32.totalorder %s3144_s28, %s3397_s1 }
   0x5   :  { %p3150_p2 = pnand %p3148_p1, %p3145_p0 }
   0x7   :  { %3153 = shalt.err (!%p3150_p2)
}
   0x8   :  { %s3154_s10 = scalar_lea.vmem %s22_s25, 25088  ;;  %p3159_p4 = scmp.lt.s32.totalorder %s22_s25, %s22_s25 }
   0x9   :  { %p3155_p3 = scmp.ne.s32.totalorder %s22_s25, %s3154_s10  ;;  %p3160_p5 = scmp.lt.s32.totalorder %s3154_s10, %s3154_s10 }
   0xb   :  { %p3161_p6 = por %p3160_p5, %p3159_p4 }
   0xd   :  { %p3162_p7 = pnand %p3161_p6, %p3155_p3 }
   0xf   :  { %3165 = shalt.err (!%p3162_p7)
}
  0x10   :  { %s3193_s11 = smov 256   ;;  %s3194_s12 = smov 16  }
  0x11   :  { %27 = dma.hbm_to_vmem [thread:$0]  %s3397_s1, 25088, %s22_s25, [#allocation3], %s3193_s11, %s3193_s11, %s3194_s12  }
  0x12   :  { %s3195_s15 = smov [#allocation4]   ;;  %s3166_s19 = scalar_lea.hbm %s3399_s3, 8192 }
  0x13   :  { %s35_s16 = sshll.u32 %s3195_s15, 4  ;;  %p3167_p8 = scmp.ne.s32.totalorder %s3399_s3, %s3166_s19  ;;  %s36_s16 = int_to_ptr.vmem [resolvable:$true] %s35_s16 }
  0x14   :  { %p3170_p9 = scmp.lt.u32.totalorder %s3166_s19, %s3399_s3 }
  0x16   :  { %p3172_p10 = pnand %p3170_p9, %p3167_p8 }
  0x18   :  { %3175 = shalt.err (!%p3172_p10)
}
  0x19   :  { %s3176_s24 = scalar_lea.vmem %s36_s16, 8192  ;;  %p3181_p12 = scmp.lt.s32.totalorder %s36_s16, %s36_s16 }
  0x1a   :  { %p3177_p11 = scmp.ne.s32.totalorder %s36_s16, %s3176_s24  ;;  %p3182_p13 = scmp.lt.s32.totalorder %s3176_s24, %s3176_s24 }
  0x1c   :  { %p3183_p0 = por %p3182_p13, %p3181_p12 }
  0x1e   :  { %p3184_p1 = pnand %p3183_p0, %p3177_p11 }
  0x20   :  { %3187 = shalt.err (!%p3184_p1)
}
  0x21   :  { %s3196_s1 = smov 128   ;;  %s3197_s25 = smov 8  }
  0x22   :  { %41 = dma.hbm_to_vmem [thread:$0]  %s3399_s3, 8192, %s36_s16, [#allocation5], %s3196_s1, %s3196_s1, %s3197_s25  }
  0x23   :  { %3188 = dma.done.wait [#allocation3], 25088  }
  0x24   :  { %3189 = vsyncadd [#allocation3], 4294942208 }
  0x25   :  { %3190 = dma.done.wait [#allocation5], 8192  }
  0x26   :  { %3191 = vsyncadd [#allocation5], 4294959104  ;;  %v2720_v0 = vld [vmem:[#allocation2 + $0x4] ss:$16 sps:$4 sm:$0xff]   ;;  %v2724_v2 = vld [vmem:[#allocation2] ss:$16 sps:$4 sm:$0xff]  }
  0x27   :  { %v2722_v1 = vld [vmem:[#allocation2 + $0x204] ss:$16 sps:$4 sm:$0xff]   ;;  %1300 = vmatprep.subr.bf16.mxu1 %v2720_v0  ;;  %v2725_v3 = vld [vmem:[#allocation2 + $0x200] ss:$16 sps:$4 sm:$0xff]   ;;  %v3269_v51 = vld [vmem:[%s3396_s0 + $0xc] ss:$28 sps:$4 sm:$0xff]  }
  0x28   :  { %1343 = vmatprep.subr.bf16.mxu0 %v2722_v1  ;;  %v2726_v4 = vld [vmem:[#allocation2 + $0x24] ss:$16 sps:$4 sm:$0xff]   ;;  %1301 = vmatpush1.bf16.msra.mxu1 %v2724_v2  ;;  %v2730_v6 = vld [vmem:[#allocation2 + $0x20] ss:$16 sps:$4 sm:$0xff]   ;;  %vm1296_vm0 = vcmask 130048  }
  0x29   :  { %1344 = vmatpush1.bf16.msra.mxu0 %v2725_v3  ;;  %v2728_v5 = vld [vmem:[#allocation2 + $0x224] ss:$16 sps:$4 sm:$0xff]   ;;  %1302 = vmatprep.subr.bf16.mxu1 %v2726_v4  ;;  %v2731_v7 = vld [vmem:[#allocation2 + $0x220] ss:$16 sps:$4 sm:$0xff]   ;;  %v2827_v3 = vld [vmem:[#allocation2 + $0xc] ss:$16 sps:$4 sm:$0xff]  }
  0x2a   :  { %1345 = vmatprep.subr.bf16.mxu0 %v2728_v5  ;;  %v2732_v8 = vld [vmem:[#allocation2 + $0x44] ss:$16 sps:$4 sm:$0xff]   ;;  %v2736_v10 = vld [vmem:[#allocation2 + $0x40] ss:$16 sps:$4 sm:$0xff]   ;;  %1375 = vmatprep.mubr.bf16.mxu0 %v3269_v51 }
  0x2b   :  { %v2734_v9 = vld [vmem:[#allocation2 + $0x244] ss:$16 sps:$4 sm:$0xff]   ;;  %v2737_v11 = vld [vmem:[#allocation2 + $0x240] ss:$16 sps:$4 sm:$0xff]  }
  0x2c   :  { %1303 = vmatpush1.bf16.msra.mxu1 %v2730_v6  ;;  %v2738_v12 = vld [vmem:[#allocation2 + $0x64] ss:$16 sps:$4 sm:$0xff]   ;;  %v2742_v14 = vld [vmem:[#allocation2 + $0x60] ss:$16 sps:$4 sm:$0xff]  }
  0x2d   :  { %1346 = vmatpush1.bf16.msra.mxu0 %v2731_v7  ;;  %1304 = vmatprep.subr.bf16.mxu1 %v2732_v8  ;;  %v2740_v13 = vld [vmem:[#allocation2 + $0x264] ss:$16 sps:$4 sm:$0xff]   ;;  %v2743_v15 = vld [vmem:[#allocation2 + $0x260] ss:$16 sps:$4 sm:$0xff]   ;;  %v2825_v7 = vld [vmem:[#allocation2 + $0x8] ss:$16 sps:$4 sm:$0xff]  }
  0x2e   :  { %1347 = vmatprep.subr.bf16.mxu0 %v2734_v9  ;;  %v2744_v16 = vld [vmem:[#allocation2 + $0x84] ss:$16 sps:$4 sm:$0xff]   ;;  %v2748_v18 = vld [vmem:[#allocation2 + $0x80] ss:$16 sps:$4 sm:$0xff]   ;;  %v2833_v9 = vld [vmem:[#allocation2 + $0x2c] ss:$16 sps:$4 sm:$0xff]  }
  0x2f   :  { %v2746_v17 = vld [vmem:[#allocation2 + $0x284] ss:$16 sps:$4 sm:$0xff]   ;;  %v2749_v19 = vld [vmem:[#allocation2 + $0x280] ss:$16 sps:$4 sm:$0xff]  }
  0x30   :  { %1305 = vmatpush1.bf16.msra.mxu1 %v2736_v10  ;;  %v2750_v20 = vld [vmem:[#allocation2 + $0xa4] ss:$16 sps:$4 sm:$0xff]   ;;  %v2754_v22 = vld [vmem:[#allocation2 + $0xa0] ss:$16 sps:$4 sm:$0xff]  }
  0x31   :  { %1348 = vmatpush1.bf16.msra.mxu0 %v2737_v11  ;;  %1306 = vmatprep.subr.bf16.mxu1 %v2738_v12  ;;  %v2752_v21 = vld [vmem:[#allocation2 + $0x2a4] ss:$16 sps:$4 sm:$0xff]   ;;  %v2755_v23 = vld [vmem:[#allocation2 + $0x2a0] ss:$16 sps:$4 sm:$0xff]   ;;  %v2831_v11 = vld [vmem:[#allocation2 + $0x28] ss:$16 sps:$4 sm:$0xff]  }
  0x32   :  { %1349 = vmatprep.subr.bf16.mxu0 %v2740_v13  ;;  %v2756_v24 = vld [vmem:[#allocation2 + $0xc4] ss:$16 sps:$4 sm:$0xff]   ;;  %v2760_v26 = vld [vmem:[#allocation2 + $0xc0] ss:$16 sps:$4 sm:$0xff]   ;;  %v2839_v13 = vld [vmem:[#allocation2 + $0x4c] ss:$16 sps:$4 sm:$0xff]  }
  0x33   :  { %v2758_v25 = vld [vmem:[#allocation2 + $0x2c4] ss:$16 sps:$4 sm:$0xff]   ;;  %v2761_v27 = vld [vmem:[#allocation2 + $0x2c0] ss:$16 sps:$4 sm:$0xff]  }
  0x34   :  { %1307 = vmatpush1.bf16.msra.mxu1 %v2742_v14  ;;  %v2762_v28 = vld [vmem:[#allocation2 + $0xe4] ss:$16 sps:$4 sm:$0xff]   ;;  %v2766_v30 = vld [vmem:[#allocation2 + $0xe0] ss:$16 sps:$4 sm:$0xff]  }
  0x35   :  { %1350 = vmatpush1.bf16.msra.mxu0 %v2743_v15  ;;  %1308 = vmatprep.subr.bf16.mxu1 %v2744_v16  ;;  %v2764_v29 = vld [vmem:[#allocation2 + $0x2e4] ss:$16 sps:$4 sm:$0xff]   ;;  %v2767_v31 = vld [vmem:[#allocation2 + $0x2e0] ss:$16 sps:$4 sm:$0xff]   ;;  %v2837_v15 = vld [vmem:[#allocation2 + $0x48] ss:$16 sps:$4 sm:$0xff]  }
  0x36   :  { %1351 = vmatprep.subr.bf16.mxu0 %v2746_v17  ;;  %v2768_v32 = vld [vmem:[#allocation2 + $0x104] ss:$16 sps:$4 sm:$0xff]   ;;  %v2772_v34 = vld [vmem:[#allocation2 + $0x100] ss:$16 sps:$4 sm:$0xff]   ;;  %v2845_v17 = vld [vmem:[#allocation2 + $0x6c] ss:$16 sps:$4 sm:$0xff]  }
  0x37   :  { %v2770_v33 = vld [vmem:[#allocation2 + $0x304] ss:$16 sps:$4 sm:$0xff]   ;;  %v2773_v35 = vld [vmem:[#allocation2 + $0x300] ss:$16 sps:$4 sm:$0xff]  }
  0x38   :  { %1309 = vmatpush1.bf16.msra.mxu1 %v2748_v18  ;;  %v2774_v36 = vld [vmem:[#allocation2 + $0x124] ss:$16 sps:$4 sm:$0xff]   ;;  %v2778_v38 = vld [vmem:[#allocation2 + $0x120] ss:$16 sps:$4 sm:$0xff]  }
  0x39   :  { %1352 = vmatpush1.bf16.msra.mxu0 %v2749_v19  ;;  %1310 = vmatprep.subr.bf16.mxu1 %v2750_v20  ;;  %v2776_v37 = vld [vmem:[#allocation2 + $0x324] ss:$16 sps:$4 sm:$0xff]   ;;  %v2779_v39 = vld [vmem:[#allocation2 + $0x320] ss:$16 sps:$4 sm:$0xff]   ;;  %v2843_v19 = vld [vmem:[#allocation2 + $0x68] ss:$16 sps:$4 sm:$0xff]  }
  0x3a   :  { %1353 = vmatprep.subr.bf16.mxu0 %v2752_v21  ;;  %v2780_v40 = vld [vmem:[#allocation2 + $0x144] ss:$16 sps:$4 sm:$0xff]   ;;  %v2784_v42 = vld [vmem:[#allocation2 + $0x140] ss:$16 sps:$4 sm:$0xff]   ;;  %v2851_v21 = vld [vmem:[#allocation2 + $0x8c] ss:$16 sps:$4 sm:$0xff]  }
  0x3b   :  { %v2782_v41 = vld [vmem:[#allocation2 + $0x344] ss:$16 sps:$4 sm:$0xff]   ;;  %v2785_v43 = vld [vmem:[#allocation2 + $0x340] ss:$16 sps:$4 sm:$0xff]  }
  0x3c   :  { %1311 = vmatpush1.bf16.msra.mxu1 %v2754_v22  ;;  %v2786_v44 = vld [vmem:[#allocation2 + $0x164] ss:$16 sps:$4 sm:$0xff]   ;;  %v2790_v46 = vld [vmem:[#allocation2 + $0x160] ss:$16 sps:$4 sm:$0xff]  }
  0x3d   :  { %1354 = vmatpush1.bf16.msra.mxu0 %v2755_v23  ;;  %1312 = vmatprep.subr.bf16.mxu1 %v2756_v24  ;;  %v2788_v45 = vld [vmem:[#allocation2 + $0x364] ss:$16 sps:$4 sm:$0xff]   ;;  %v2791_v47 = vld [vmem:[#allocation2 + $0x360] ss:$16 sps:$4 sm:$0xff]   ;;  %v2849_v23 = vld [vmem:[#allocation2 + $0x88] ss:$16 sps:$4 sm:$0xff]  }
  0x3e   :  { %1355 = vmatprep.subr.bf16.mxu0 %v2758_v25  ;;  %v2792_v48 = vld [vmem:[#allocation2 + $0x184] ss:$16 sps:$4 sm:$0xff]   ;;  %v2796_v52 = vld [vmem:[#allocation2 + $0x180] ss:$16 sps:$4 sm:$0xff]   ;;  %v2857_v25 = vld [vmem:[#allocation2 + $0xac] ss:$16 sps:$4 sm:$0xff]  }
  0x3f   :  { %v2818_v49 = vld [vmem:[%s3396_s0 + $0x4] ss:$28 sps:$4 sm:$0xff]  }
  0x40   :  { %1313 = vmatpush1.bf16.msra.mxu1 %v2760_v26  ;;  %v2794_v50 = vld [vmem:[#allocation2 + $0x384] ss:$16 sps:$4 sm:$0xff]   ;;  %1332 = vmatprep.mubr.bf16.mxu1 %v2818_v49  ;;  %v2797_v53 = vld [vmem:[#allocation2 + $0x380] ss:$16 sps:$4 sm:$0xff]  }
  0x41   :  { %1356 = vmatpush1.bf16.msra.mxu0 %v2761_v27  ;;  %1314 = vmatprep.subr.bf16.mxu1 %v2762_v28  ;;  %v2798_v54 = vld [vmem:[#allocation2 + $0x1a4] ss:$16 sps:$4 sm:$0xff]   ;;  %v2802_v56 = vld [vmem:[#allocation2 + $0x1a0] ss:$16 sps:$4 sm:$0xff]   ;;  %v2855_v27 = vld [vmem:[#allocation2 + $0xa8] ss:$16 sps:$4 sm:$0xff]  }
  0x42   :  { %1357 = vmatprep.subr.bf16.mxu0 %v2764_v29  ;;  %v2800_v55 = vld [vmem:[#allocation2 + $0x3a4] ss:$16 sps:$4 sm:$0xff]   ;;  %v2803_v57 = vld [vmem:[#allocation2 + $0x3a0] ss:$16 sps:$4 sm:$0xff]   ;;  %v2863_v29 = vld [vmem:[#allocation2 + $0xcc] ss:$16 sps:$4 sm:$0xff]  }
  0x43   :  { %v2804_v58 = vld [vmem:[#allocation2 + $0x1c4] ss:$16 sps:$4 sm:$0xff]   ;;  %v2808_v60 = vld [vmem:[#allocation2 + $0x1c0] ss:$16 sps:$4 sm:$0xff]  }
  0x44   :  { %1315 = vmatpush1.bf16.msra.mxu1 %v2766_v30  ;;  %v2806_v59 = vld [vmem:[#allocation2 + $0x3c4] ss:$16 sps:$4 sm:$0xff]   ;;  %v2809_v61 = vld [vmem:[#allocation2 + $0x3c0] ss:$16 sps:$4 sm:$0xff]  }
  0x45   :  { %1358 = vmatpush1.bf16.msra.mxu0 %v2767_v31  ;;  %1316 = vmatprep.subr.bf16.mxu1 %v2768_v32  ;;  %v2810_v62 = vld [vmem:[#allocation2 + $0x1e4] ss:$16 sps:$4 sm:$0xff]   ;;  %v2814_v0 = vld [vmem:[#allocation2 + $0x1e0] ss:$16 sps:$4 sm:$0xff]   ;;  %v2861_v31 = vld [vmem:[#allocation2 + $0xc8] ss:$16 sps:$4 sm:$0xff]  }
  0x46   :  { %1359 = vmatprep.subr.bf16.mxu0 %v2770_v33  ;;  %v2812_v63 = vld [vmem:[#allocation2 + $0x3e4] ss:$16 sps:$4 sm:$0xff]   ;;  %v2815_v1 = vld [vmem:[#allocation2 + $0x3e0] ss:$16 sps:$4 sm:$0xff]   ;;  %v2869_v33 = vld [vmem:[#allocation2 + $0xec] ss:$16 sps:$4 sm:$0xff]  }
  0x47   :  { %v2824_v2 = vld [vmem:[#allocation2 + $0x404] ss:$16 sps:$4 sm:$0xff]   ;;  %v3275_v4 = vld [vmem:[%s3396_s0] ss:$28 sps:$4 sm:$0xff]  }
  0x48   :  { %1317 = vmatpush1.bf16.msra.mxu1 %v2772_v34  ;;  %v3280_v5 = vld [vmem:[%s3396_s0 + $0x8] ss:$28 sps:$4 sm:$0xff]   ;;  %v2822_v6 = vld [vmem:[#allocation2 + $0x400] ss:$16 sps:$4 sm:$0xff]  }
  0x49   :  { %1360 = vmatpush1.bf16.msra.mxu0 %v2773_v35  ;;  %1318 = vmatprep.subr.bf16.mxu1 %v2774_v36  ;;  %v2830_v8 = vld [vmem:[#allocation2 + $0x424] ss:$16 sps:$4 sm:$0xff]   ;;  %v2828_v10 = vld [vmem:[#allocation2 + $0x420] ss:$16 sps:$4 sm:$0xff]   ;;  %v2867_v36 = vld [vmem:[#allocation2 + $0xe8] ss:$16 sps:$4 sm:$0xff]  }
  0x4a   :  { %1361 = vmatprep.subr.bf16.mxu0 %v2776_v37  ;;  %v2836_v12 = vld [vmem:[#allocation2 + $0x444] ss:$16 sps:$4 sm:$0xff]   ;;  %v2834_v14 = vld [vmem:[#allocation2 + $0x440] ss:$16 sps:$4 sm:$0xff]  }
  0x4b   :  { %v2842_v16 = vld [vmem:[#allocation2 + $0x464] ss:$16 sps:$4 sm:$0xff]   ;;  %v2840_v18 = vld [vmem:[#allocation2 + $0x460] ss:$16 sps:$4 sm:$0xff]  }
  0x4c   :  { %1319 = vmatpush1.bf16.msra.mxu1 %v2778_v38  ;;  %v2848_v20 = vld [vmem:[#allocation2 + $0x484] ss:$16 sps:$4 sm:$0xff]   ;;  %v2846_v22 = vld [vmem:[#allocation2 + $0x480] ss:$16 sps:$4 sm:$0xff]   ;;  %v2875_v38 = vld [vmem:[#allocation2 + $0x10c] ss:$16 sps:$4 sm:$0xff]  }
  0x4d   :  { %1362 = vmatpush1.bf16.msra.mxu0 %v2779_v39  ;;  %1320 = vmatprep.subr.bf16.mxu1 %v2780_v40  ;;  %v2854_v24 = vld [vmem:[#allocation2 + $0x4a4] ss:$16 sps:$4 sm:$0xff]   ;;  %v2852_v26 = vld [vmem:[#allocation2 + $0x4a0] ss:$16 sps:$4 sm:$0xff]   ;;  %v2873_v40 = vld [vmem:[#allocation2 + $0x108] ss:$16 sps:$4 sm:$0xff]  }
  0x4e   :  { %1363 = vmatprep.subr.bf16.mxu0 %v2782_v41  ;;  %v2860_v28 = vld [vmem:[#allocation2 + $0x4c4] ss:$16 sps:$4 sm:$0xff]   ;;  %v2858_v30 = vld [vmem:[#allocation2 + $0x4c0] ss:$16 sps:$4 sm:$0xff]  }
  0x4f   :  { %v2866_v32 = vld [vmem:[#allocation2 + $0x4e4] ss:$16 sps:$4 sm:$0xff]   ;;  %v2864_v35 = vld [vmem:[#allocation2 + $0x4e0] ss:$16 sps:$4 sm:$0xff]  }
  0x50   :  { %1321 = vmatpush1.bf16.msra.mxu1 %v2784_v42  ;;  %v3287_v34 = vld [vmem:[%s3396_s0 + $0x14] ss:$28 sps:$4 sm:$0xff]   ;;  %v2881_v42 = vld [vmem:[#allocation2 + $0x12c] ss:$16 sps:$4 sm:$0xff]  }
  0x51   :  { %1364 = vmatpush1.bf16.msra.mxu0 %v2785_v43  ;;  %1322 = vmatprep.subr.bf16.mxu1 %v2786_v44  ;;  %v2872_v37 = vld [vmem:[#allocation2 + $0x504] ss:$16 sps:$4 sm:$0xff]   ;;  %v2870_v39 = vld [vmem:[#allocation2 + $0x500] ss:$16 sps:$4 sm:$0xff]   ;;  %v2879_v44 = vld [vmem:[#allocation2 + $0x128] ss:$16 sps:$4 sm:$0xff]  }
  0x52   :  { %1365 = vmatprep.subr.bf16.mxu0 %v2788_v45  ;;  %v2878_v41 = vld [vmem:[#allocation2 + $0x524] ss:$16 sps:$4 sm:$0xff]   ;;  %v2876_v43 = vld [vmem:[#allocation2 + $0x520] ss:$16 sps:$4 sm:$0xff]  }
  0x53   :  { %v2884_v45 = vld [vmem:[#allocation2 + $0x544] ss:$16 sps:$4 sm:$0xff]  }
  0x54   :  { %1323 = vmatpush1.bf16.msra.mxu1 %v2790_v46  ;;  %v2887_v46 = vld [vmem:[#allocation2 + $0x14c] ss:$16 sps:$4 sm:$0xff]  }
  0x55   :  { %1366 = vmatpush1.bf16.msra.mxu0 %v2791_v47  ;;  %1324 = vmatprep.subr.bf16.mxu1 %v2792_v48  ;;  %v2882_v47 = vld [vmem:[#allocation2 + $0x540] ss:$16 sps:$4 sm:$0xff]   ;;  %v2885_v48 = vld [vmem:[#allocation2 + $0x148] ss:$16 sps:$4 sm:$0xff]  }
  0x56   :  { %1367 = vmatprep.subr.bf16.mxu0 %v2794_v50  ;;  %v2893_v50 = vld [vmem:[#allocation2 + $0x16c] ss:$16 sps:$4 sm:$0xff]  }
  0x58   :  { %1325 = vmatpush1.bf16.msra.mxu1 %v2796_v52  ;;  %v2888_v52 = vld [vmem:[#allocation2 + $0x560] ss:$16 sps:$4 sm:$0xff]  }
  0x59   :  { %1368 = vmatpush1.bf16.msra.mxu0 %v2797_v53  ;;  %1326 = vmatprep.subr.bf16.mxu1 %v2798_v54  ;;  %v2891_v53 = vld [vmem:[#allocation2 + $0x168] ss:$16 sps:$4 sm:$0xff]   ;;  %v2896_v54 = vld [vmem:[#allocation2 + $0x584] ss:$16 sps:$4 sm:$0xff]  }
  0x5a   :  { %1369 = vmatprep.subr.bf16.mxu0 %v2800_v55  ;;  %v2899_v55 = vld [vmem:[#allocation2 + $0x18c] ss:$16 sps:$4 sm:$0xff]  }
  0x5c   :  { %1327 = vmatpush1.bf16.msra.mxu1 %v2802_v56  ;;  %v2894_v56 = vld [vmem:[#allocation2 + $0x580] ss:$16 sps:$4 sm:$0xff]  }
  0x5d   :  { %1370 = vmatpush1.bf16.msra.mxu0 %v2803_v57  ;;  %1328 = vmatprep.subr.bf16.mxu1 %v2804_v58  ;;  %v2897_v57 = vld [vmem:[#allocation2 + $0x188] ss:$16 sps:$4 sm:$0xff]   ;;  %v2902_v58 = vld [vmem:[#allocation2 + $0x5a4] ss:$16 sps:$4 sm:$0xff]  }
  0x5e   :  { %1371 = vmatprep.subr.bf16.mxu0 %v2806_v59  ;;  %v2905_v59 = vld [vmem:[#allocation2 + $0x1ac] ss:$16 sps:$4 sm:$0xff]  }
  0x60   :  { %1329 = vmatpush1.bf16.msra.mxu1 %v2808_v60  ;;  %v2900_v60 = vld [vmem:[#allocation2 + $0x5a0] ss:$16 sps:$4 sm:$0xff]  }
  0x61   :  { %1372 = vmatpush1.bf16.msra.mxu0 %v2809_v61  ;;  %1330 = vmatprep.subr.bf16.mxu1 %v2810_v62  ;;  %v2903_v61 = vld [vmem:[#allocation2 + $0x1a8] ss:$16 sps:$4 sm:$0xff]   ;;  %v2908_v62 = vld [vmem:[#allocation2 + $0x5c4] ss:$16 sps:$4 sm:$0xff]  }
  0x62   :  { %1373 = vmatprep.subr.bf16.mxu0 %v2812_v63  ;;  %v2911_v63 = vld [vmem:[#allocation2 + $0x1cc] ss:$16 sps:$4 sm:$0xff]  }
  0x64   :  { %1331 = vmatpush1.bf16.msra.mxu1 %v2814_v0  ;;  %v2906_v0 = vld [vmem:[#allocation2 + $0x5c0] ss:$16 sps:$4 sm:$0xff]  }
  0x65   :  { %1374 = vmatpush1.bf16.msra.mxu0 %v2815_v1  ;;  %1472 = vmatprep.subr.bf16.mxu1 %v2827_v3  ;;  %v2909_v1 = vld [vmem:[#allocation2 + $0x1c8] ss:$16 sps:$4 sm:$0xff]   ;;  %v2917_v3 = vld [vmem:[#allocation2 + $0x1ec] ss:$16 sps:$4 sm:$0xff]  }
  0x66   :  { %1386 = vmatprep.subr.bf16.mxu0 %v2824_v2  ;;  %v2914_v2 = vld [vmem:[#allocation2 + $0x5e4] ss:$16 sps:$4 sm:$0xff]  }
  0x67   :  { %1333 = vmatmul.mubr.bf16.vlgmr.msra.gmra.mrb[0].mxu1 %v3275_v4 }
  0x68   :  { %1376 = vmatmul.mubr.bf16.vlgmr.msra.gmra.mrb[0].mxu0 %v3280_v5  ;;  %1473 = vmatpush1.bf16.msra.mxu1 %v2825_v7  ;;  %v2915_v7 = vld [vmem:[#allocation2 + $0x1e8] ss:$16 sps:$4 sm:$0xff]  }
  0x69   :  { %1387 = vmatpush1.bf16.msra.mxu0 %v2822_v6  ;;  %1474 = vmatprep.subr.bf16.mxu1 %v2833_v9  ;;  %v2912_v6 = vld [vmem:[#allocation2 + $0x5e0] ss:$16 sps:$4 sm:$0xff]   ;;  %v2929_v9 = vld [vmem:[#allocation2 + $0x604] ss:$16 sps:$4 sm:$0xff]  }
  0x6a   :  { %1388 = vmatprep.subr.bf16.mxu0 %v2830_v8  ;;  %1504 = vmatprep.mubr.bf16.mxu1 %v2818_v49  ;;  %v2890_v49 = vld [vmem:[#allocation2 + $0x564] ss:$16 sps:$4 sm:$0xff]   ;;  %v2923_v8 = vld [vmem:[#allocation2 + $0x20c] ss:$16 sps:$4 sm:$0xff]  }
  0x6b   :  { %1418 = vmatprep.mubr.bf16.mxu0 %v3287_v34 }
  0x6c   :  { %1475 = vmatpush1.bf16.msra.mxu1 %v2831_v11  ;;  %v2921_v11 = vld [vmem:[#allocation2 + $0x208] ss:$16 sps:$4 sm:$0xff]  }
  0x6d   :  { %1389 = vmatpush1.bf16.msra.mxu0 %v2828_v10  ;;  %1476 = vmatprep.subr.bf16.mxu1 %v2839_v13  ;;  %v3293_v10 = vld [vmem:[%s3396_s0 + $0x10] ss:$28 sps:$4 sm:$0xff]  }
  0x6e   :  { %1390 = vmatprep.subr.bf16.mxu0 %v2836_v12  ;;  %v2927_v12 = vld [vmem:[#allocation2 + $0x600] ss:$16 sps:$4 sm:$0xff]   ;;  %v2926_v13 = vld [vmem:[#allocation2 + $0x22c] ss:$16 sps:$4 sm:$0xff]  }
  0x70   :  { %1477 = vmatpush1.bf16.msra.mxu1 %v2837_v15  ;;  %v2932_v15 = vld [vmem:[#allocation2 + $0x24c] ss:$16 sps:$4 sm:$0xff]  }
  0x71   :  { %1391 = vmatpush1.bf16.msra.mxu0 %v2834_v14  ;;  %1478 = vmatprep.subr.bf16.mxu1 %v2845_v17  ;;  %v2924_v14 = vld [vmem:[#allocation2 + $0x228] ss:$16 sps:$4 sm:$0xff]   ;;  %v3020_v17 = vld [vmem:[#allocation2 + $0x60c] ss:$16 sps:$4 sm:$0xff]  }
  0x72   :  { %1392 = vmatprep.subr.bf16.mxu0 %v2842_v16  ;;  %v3198_v16 = vmov 0  }
  0x74   :  { %1479 = vmatpush1.bf16.msra.mxu1 %v2843_v19  ;;  %v2936_v19 = vld [vmem:[#allocation2 + $0x26c] ss:$16 sps:$4 sm:$0xff]  }
  0x75   :  { %1393 = vmatpush1.bf16.msra.mxu0 %v2840_v18  ;;  %1480 = vmatprep.subr.bf16.mxu1 %v2851_v21  ;;  %v2930_v18 = vld [vmem:[#allocation2 + $0x248] ss:$16 sps:$4 sm:$0xff]  }
  0x76   :  { %1394 = vmatprep.subr.bf16.mxu0 %v2848_v20  ;;  %v2933_v20 = vld [vmem:[%s3396_s0 + $0x18] ss:$28 sps:$4 sm:$0xff]  }
  0x77   :  { %v3018_v21 = vld [vmem:[#allocation2 + $0x608] ss:$16 sps:$4 sm:$0xff]  }
  0x78   :  { %1481 = vmatpush1.bf16.msra.mxu1 %v2849_v23  ;;  %v2937_v23 = vld [vmem:[#allocation2 + $0x288] ss:$16 sps:$4 sm:$0xff]  }
  0x79   :  { %1395 = vmatpush1.bf16.msra.mxu0 %v2846_v22  ;;  %1482 = vmatprep.subr.bf16.mxu1 %v2857_v25  ;;  %v2939_v22 = vld [vmem:[#allocation2 + $0x28c] ss:$16 sps:$4 sm:$0xff]  }
  0x7a   :  { %1396 = vmatprep.subr.bf16.mxu0 %v2854_v24  ;;  %v2942_v24 = vld [vmem:[#allocation2 + $0x2ac] ss:$16 sps:$4 sm:$0xff]  }
  0x7b   :  { %v2945_v25 = vld [vmem:[#allocation2 + $0x2cc] ss:$16 sps:$4 sm:$0xff]  }
  0x7c   :  { %1483 = vmatpush1.bf16.msra.mxu1 %v2855_v27  ;;  %v2948_v27 = vld [vmem:[#allocation2 + $0x2ec] ss:$16 sps:$4 sm:$0xff]  }
  0x7d   :  { %1397 = vmatpush1.bf16.msra.mxu0 %v2852_v26  ;;  %1484 = vmatprep.subr.bf16.mxu1 %v2863_v29  ;;  %v2943_v26 = vld [vmem:[#allocation2 + $0x2c8] ss:$16 sps:$4 sm:$0xff]   ;;  %v3026_v29 = vld [vmem:[#allocation4 + $0x4] ss:$8 sps:$4 sm:$0xff]  }
  0x7e   :  { %1398 = vmatprep.subr.bf16.mxu0 %v2860_v28  ;;  %v3024_v28 = vld [vmem:[#allocation4] ss:$8 sps:$4 sm:$0xff]  }
  0x80   :  { %1485 = vmatpush1.bf16.msra.mxu1 %v2861_v31  ;;  %v2946_v31 = vld [vmem:[#allocation2 + $0x2e8] ss:$16 sps:$4 sm:$0xff]  }
  0x81   :  { %1399 = vmatpush1.bf16.msra.mxu0 %v2858_v30  ;;  %1486 = vmatprep.subr.bf16.mxu1 %v2869_v33  ;;  %v3029_v30 = vld [vmem:[#allocation4 + $0x14] ss:$8 sps:$4 sm:$0xff]   ;;  %v3027_v33 = vld [vmem:[#allocation4 + $0x10] ss:$8 sps:$4 sm:$0xff]  }
  0x82   :  { %1400 = vmatprep.subr.bf16.mxu0 %v2866_v32  ;;  %v2951_v32 = vld [vmem:[#allocation2 + $0x30c] ss:$16 sps:$4 sm:$0xff]  }
  0x84   :  { %1487 = vmatpush1.bf16.msra.mxu1 %v2867_v36  ;;  %v2949_v36 = vld [vmem:[#allocation2 + $0x308] ss:$16 sps:$4 sm:$0xff]  }
  0x85   :  { %1401 = vmatpush1.bf16.msra.mxu0 %v2864_v35  ;;  %1488 = vmatprep.subr.bf16.mxu1 %v2875_v38  ;;  %v3032_v35 = vld [vmem:[#allocation4 + $0x24] ss:$8 sps:$4 sm:$0xff]   ;;  %v3030_v38 = vld [vmem:[#allocation4 + $0x20] ss:$8 sps:$4 sm:$0xff]  }
  0x86   :  { %1402 = vmatprep.subr.bf16.mxu0 %v2872_v37  ;;  %v2954_v37 = vld [vmem:[#allocation2 + $0x32c] ss:$16 sps:$4 sm:$0xff]  }
  0x88   :  { %1489 = vmatpush1.bf16.msra.mxu1 %v2873_v40  ;;  %v3035_v40 = vld [vmem:[#allocation4 + $0x34] ss:$8 sps:$4 sm:$0xff]  }
  0x89   :  { %1403 = vmatpush1.bf16.msra.mxu0 %v2870_v39  ;;  %1490 = vmatprep.subr.bf16.mxu1 %v2881_v42  ;;  %v2952_v39 = vld [vmem:[#allocation2 + $0x328] ss:$16 sps:$4 sm:$0xff]  }
  0x8a   :  { %1404 = vmatprep.subr.bf16.mxu0 %v2878_v41  ;;  %v2957_v41 = vld [vmem:[#allocation2 + $0x34c] ss:$16 sps:$4 sm:$0xff]   ;;  %v3033_v42 = vld [vmem:[#allocation4 + $0x30] ss:$8 sps:$4 sm:$0xff]  }
  0x8c   :  { %1491 = vmatpush1.bf16.msra.mxu1 %v2879_v44  ;;  %v2955_v44 = vld [vmem:[#allocation2 + $0x348] ss:$16 sps:$4 sm:$0xff]  }
  0x8d   :  { %1405 = vmatpush1.bf16.msra.mxu0 %v2876_v43  ;;  %1492 = vmatprep.subr.bf16.mxu1 %v2887_v46  ;;  %v3038_v43 = vld [vmem:[#allocation4 + $0x44] ss:$8 sps:$4 sm:$0xff]   ;;  %v3036_v46 = vld [vmem:[#allocation4 + $0x40] ss:$8 sps:$4 sm:$0xff]  }
  0x8e   :  { %1406 = vmatprep.subr.bf16.mxu0 %v2884_v45  ;;  %v2960_v45 = vld [vmem:[#allocation2 + $0x36c] ss:$16 sps:$4 sm:$0xff]  }
  0x90   :  { %1493 = vmatpush1.bf16.msra.mxu1 %v2885_v48  ;;  %v2958_v48 = vld [vmem:[#allocation2 + $0x368] ss:$16 sps:$4 sm:$0xff]  }
  0x91   :  { %1407 = vmatpush1.bf16.msra.mxu0 %v2882_v47  ;;  %1494 = vmatprep.subr.bf16.mxu1 %v2893_v50  ;;  %v3041_v47 = vld [vmem:[#allocation4 + $0x54] ss:$8 sps:$4 sm:$0xff]   ;;  %v3039_v50 = vld [vmem:[#allocation4 + $0x50] ss:$8 sps:$4 sm:$0xff]  }
  0x92   :  { %1408 = vmatprep.subr.bf16.mxu0 %v2890_v49  ;;  %v2963_v49 = vld [vmem:[#allocation2 + $0x38c] ss:$16 sps:$4 sm:$0xff]  }
  0x94   :  { %1495 = vmatpush1.bf16.msra.mxu1 %v2891_v53  ;;  %v2961_v53 = vld [vmem:[#allocation2 + $0x388] ss:$16 sps:$4 sm:$0xff]  }
  0x95   :  { %1409 = vmatpush1.bf16.msra.mxu0 %v2888_v52  ;;  %1496 = vmatprep.subr.bf16.mxu1 %v2899_v55  ;;  %v3044_v52 = vld [vmem:[#allocation4 + $0x64] ss:$8 sps:$4 sm:$0xff]   ;;  %v3042_v55 = vld [vmem:[#allocation4 + $0x60] ss:$8 sps:$4 sm:$0xff]  }
  0x96   :  { %1410 = vmatprep.subr.bf16.mxu0 %v2896_v54  ;;  %v2966_v54 = vld [vmem:[#allocation2 + $0x3ac] ss:$16 sps:$4 sm:$0xff]  }
  0x98   :  { %1497 = vmatpush1.bf16.msra.mxu1 %v2897_v57  ;;  %v2964_v57 = vld [vmem:[#allocation2 + $0x3a8] ss:$16 sps:$4 sm:$0xff]  }
  0x99   :  { %1411 = vmatpush1.bf16.msra.mxu0 %v2894_v56  ;;  %1498 = vmatprep.subr.bf16.mxu1 %v2905_v59  ;;  %v3047_v56 = vld [vmem:[#allocation4 + $0x74] ss:$8 sps:$4 sm:$0xff]   ;;  %v3045_v59 = vld [vmem:[#allocation4 + $0x70] ss:$8 sps:$4 sm:$0xff]  }
  0x9a   :  { %1412 = vmatprep.subr.bf16.mxu0 %v2902_v58  ;;  %v2969_v58 = vld [vmem:[#allocation2 + $0x3cc] ss:$16 sps:$4 sm:$0xff]  }
  0x9c   :  { %1499 = vmatpush1.bf16.msra.mxu1 %v2903_v61  ;;  %v2967_v61 = vld [vmem:[#allocation2 + $0x3c8] ss:$16 sps:$4 sm:$0xff]  }
  0x9d   :  { %1413 = vmatpush1.bf16.msra.mxu0 %v2900_v60  ;;  %1500 = vmatprep.subr.bf16.mxu1 %v2911_v63  ;;  %v3050_v60 = vld [vmem:[#allocation4 + $0x84] ss:$8 sps:$4 sm:$0xff]   ;;  %v3048_v63 = vld [vmem:[#allocation4 + $0x80] ss:$8 sps:$4 sm:$0xff]  }
  0x9e   :  { %1414 = vmatprep.subr.bf16.mxu0 %v2908_v62  ;;  %v2972_v62 = vld [vmem:[#allocation2 + $0x3ec] ss:$16 sps:$4 sm:$0xff]  }
  0xa0   :  { %1501 = vmatpush1.bf16.msra.mxu1 %v2909_v1  ;;  %v2970_v1 = vld [vmem:[#allocation2 + $0x3e8] ss:$16 sps:$4 sm:$0xff]  }
  0xa1   :  { %1415 = vmatpush1.bf16.msra.mxu0 %v2906_v0  ;;  %1502 = vmatprep.subr.bf16.mxu1 %v2917_v3  ;;  %v3053_v0 = vld [vmem:[#allocation4 + $0x94] ss:$8 sps:$4 sm:$0xff]   ;;  %v3051_v3 = vld [vmem:[#allocation4 + $0x90] ss:$8 sps:$4 sm:$0xff]  }
  0xa2   :  { %1416 = vmatprep.subr.bf16.mxu0 %v2914_v2  ;;  %v2975_v2 = vld [vmem:[#allocation2 + $0x40c] ss:$16 sps:$4 sm:$0xff]  }
  0xa4   :  { %1503 = vmatpush1.bf16.msra.mxu1 %v2915_v7  ;;  %v2973_v7 = vld [vmem:[#allocation2 + $0x408] ss:$16 sps:$4 sm:$0xff]  }
  0xa5   :  { %1417 = vmatpush1.bf16.msra.mxu0 %v2912_v6  ;;  %1515 = vmatprep.subr.bf16.mxu1 %v2923_v8  ;;  %v3056_v6 = vld [vmem:[#allocation4 + $0xa4] ss:$8 sps:$4 sm:$0xff]  }
  0xa6   :  { %1429 = vmatprep.subr.bf16.mxu0 %v2929_v9  ;;  %v2978_v8 = vld [vmem:[#allocation2 + $0x42c] ss:$16 sps:$4 sm:$0xff]   ;;  %v3054_v9 = vld [vmem:[#allocation4 + $0xa0] ss:$8 sps:$4 sm:$0xff]  }
  0xa7   :  { %1505 = vmatmul.mubr.bf16.vlgmr.msra.gmra.mrb[4].mxu1 %v3275_v4  ;;  %v2934_v4 = vld [vmem:[#allocation2 + $0x268] ss:$16 sps:$4 sm:$0xff]  }
  0xa8   :  { %1419 = vmatmul.mubr.bf16.vlgmr.msra.gmra.mrb[0].mxu0 %v3293_v10  ;;  %1516 = vmatpush1.bf16.msra.mxu1 %v2921_v11  ;;  %v3059_v11 = vld [vmem:[#allocation4 + $0xb4] ss:$8 sps:$4 sm:$0xff]  }
  0xa9   :  { %1430 = vmatpush1.bf16.msra.mxu0 %v2927_v12  ;;  %1517 = vmatprep.subr.bf16.mxu1 %v2926_v13  ;;  %v2976_v12 = vld [vmem:[#allocation2 + $0x428] ss:$16 sps:$4 sm:$0xff]   ;;  %v2981_v13 = vld [vmem:[#allocation2 + $0x44c] ss:$16 sps:$4 sm:$0xff]  }
  0xaa   :  { %1461 = vmatprep.mubr.bf16.mxu0 %v3198_v16  ;;  %1547 = vmatprep.mubr.bf16.mxu1 %v3269_v51  ;;  %v2940_v51 = vld [vmem:[#allocation2 + $0x2a8] ss:$16 sps:$4 sm:$0xff]  }
  0xab   :  { %1601 = vmatprep.subr.bf16.mxu0 %v3020_v17  ;;  %v2984_v17 = vld [vmem:[#allocation2 + $0x46c] ss:$16 sps:$4 sm:$0xff]  }
  0xac   :  { %1518 = vmatpush1.bf16.msra.mxu1 %v2924_v14  ;;  %v3057_v14 = vld [vmem:[#allocation4 + $0xb0] ss:$8 sps:$4 sm:$0xff]  }
  0xad   :  { %1519 = vmatprep.subr.bf16.mxu1 %v2932_v15  ;;  %v3062_v15 = vld [vmem:[#allocation4 + $0xc4] ss:$8 sps:$4 sm:$0xff]  }
  0xb0   :  { %1520 = vmatpush1.bf16.msra.mxu1 %v2930_v18  ;;  %v3060_v18 = vld [vmem:[#allocation4 + $0xc0] ss:$8 sps:$4 sm:$0xff]  }
  0xb1   :  { %1521 = vmatprep.subr.bf16.mxu1 %v2936_v19  ;;  %v3065_v19 = vld [vmem:[#allocation4 + $0xd4] ss:$8 sps:$4 sm:$0xff]  }
  0xb4   :  { %2559 = vmatmul.mubr.msk.bf16.vlgmr.msra.gmra.mrb[0].mxu0 %vm1296_vm0, %v2933_v20  ;;  %1522 = vmatpush1.bf16.msra.mxu1 %v2934_v4  ;;  %v2985_v4 = vld [vmem:[#allocation2 + $0x488] ss:$16 sps:$4 sm:$0xff]  }
  0xb5   :  { %1602 = vmatpush1.bf16.msra.mxu0 %v3018_v21  ;;  %1523 = vmatprep.subr.bf16.mxu1 %v2939_v22  ;;  %v2990_v21 = vld [vmem:[#allocation2 + $0x4ac] ss:$16 sps:$4 sm:$0xff]   ;;  %v2988_v22 = vld [vmem:[#allocation2 + $0x4a8] ss:$16 sps:$4 sm:$0xff]  }
  0xb6   :  { %1633 = vmatprep.mubr.bf16.mxu0 %v3198_v16  ;;  %2052 = vmatprep.subr.bf16.mxu0 %v3026_v29  ;;  %v2979_v16 = vld [vmem:[#allocation2 + $0x448] ss:$16 sps:$4 sm:$0xff]   ;;  %v3068_v29 = vld [vmem:[#allocation4 + $0xe4] ss:$8 sps:$4 sm:$0xff]  }
  0xb8   :  { %1524 = vmatpush1.bf16.msra.mxu1 %v2937_v23  ;;  %v2993_v23 = vld [vmem:[#allocation2 + $0x4cc] ss:$16 sps:$4 sm:$0xff]  }
  0xb9   :  { %1525 = vmatprep.subr.bf16.mxu1 %v2942_v24  ;;  %v2991_v24 = vld [vmem:[#allocation2 + $0x4c8] ss:$16 sps:$4 sm:$0xff]  }
  0xbc   :  { %2560 = vmatmul.mubr.msk.bf16.vlgmr.msra.gmra.mrb[4].mxu0 %vm1296_vm0, %v2933_v20  ;;  %1526 = vmatpush1.bf16.msra.mxu1 %v2940_v51  ;;  %v2987_v20 = vld [vmem:[#allocation2 + $0x48c] ss:$16 sps:$4 sm:$0xff]  }
  0xbd   :  { %1527 = vmatprep.subr.bf16.mxu1 %v2945_v25  ;;  %2053 = vmatpush1.bf16.msra.mxu0 %v3024_v28  ;;  %v2996_v51 = vld [vmem:[#allocation2 + $0x4ec] ss:$16 sps:$4 sm:$0xff]   ;;  %v2994_v25 = vld [vmem:[#allocation2 + $0x4e8] ss:$16 sps:$4 sm:$0xff]  }
  0xbe   :  { %2054 = vmatprep.subr.bf16.mxu0 %v3029_v30  ;;  %v3002_v28 = vld [vmem:[#allocation2 + $0x52c] ss:$16 sps:$4 sm:$0xff]   ;;  %v3000_v30 = vld [vmem:[#allocation2 + $0x528] ss:$16 sps:$4 sm:$0xff]  }
  0xc0   :  { %1528 = vmatpush1.bf16.msra.mxu1 %v2943_v26  ;;  %v2999_v26 = vld [vmem:[#allocation2 + $0x50c] ss:$16 sps:$4 sm:$0xff]  }
  0xc1   :  { %1529 = vmatprep.subr.bf16.mxu1 %v2948_v27  ;;  %2055 = vmatpush1.bf16.msra.mxu0 %v3027_v33  ;;  %v2997_v27 = vld [vmem:[#allocation2 + $0x508] ss:$16 sps:$4 sm:$0xff]   ;;  %v3071_v33 = vld [vmem:[#allocation4 + $0xf4] ss:$8 sps:$4 sm:$0xff]  }
  0xc2   :  { %2056 = vmatprep.subr.bf16.mxu0 %v3032_v35  ;;  %v3003_v35 = vld [vmem:[#allocation2 + $0x548] ss:$16 sps:$4 sm:$0xff]  }
  0xc4   :  { %1530 = vmatpush1.bf16.msra.mxu1 %v2946_v31  ;;  %v3066_v31 = vld [vmem:[#allocation4 + $0xe0] ss:$8 sps:$4 sm:$0xff]  }
  0xc5   :  { %1531 = vmatprep.subr.bf16.mxu1 %v2951_v32  ;;  %2057 = vmatpush1.bf16.msra.mxu0 %v3030_v38  ;;  %v3005_v32 = vld [vmem:[#allocation2 + $0x54c] ss:$16 sps:$4 sm:$0xff]   ;;  %v3006_v38 = vld [vmem:[#allocation2 + $0x568] ss:$16 sps:$4 sm:$0xff]  }
  0xc6   :  { %2058 = vmatprep.subr.bf16.mxu0 %v3035_v40  ;;  %v3074_v40 = vld [vmem:[#allocation4 + $0x104] ss:$8 sps:$4 sm:$0xff]  }
  0xc8   :  { %1532 = vmatpush1.bf16.msra.mxu1 %v2949_v36  ;;  %v3069_v36 = vld [vmem:[#allocation4 + $0xf0] ss:$8 sps:$4 sm:$0xff]  }
  0xc9   :  { %1533 = vmatprep.subr.bf16.mxu1 %v2954_v37  ;;  %2059 = vmatpush1.bf16.msra.mxu0 %v3033_v42  ;;  %v3008_v37 = vld [vmem:[#allocation2 + $0x56c] ss:$16 sps:$4 sm:$0xff]  }
  0xca   :  { %2060 = vmatprep.subr.bf16.mxu0 %v3038_v43  ;;  %v3014_v42 = vld [vmem:[#allocation2 + $0x5ac] ss:$16 sps:$4 sm:$0xff]   ;;  %v3012_v43 = vld [vmem:[#allocation2 + $0x5a8] ss:$16 sps:$4 sm:$0xff]  }
  0xcc   :  { %1534 = vmatpush1.bf16.msra.mxu1 %v2952_v39  ;;  %v3011_v39 = vld [vmem:[#allocation2 + $0x58c] ss:$16 sps:$4 sm:$0xff]  }
  0xcd   :  { %1535 = vmatprep.subr.bf16.mxu1 %v2957_v41  ;;  %2061 = vmatpush1.bf16.msra.mxu0 %v3036_v46  ;;  %v3009_v41 = vld [vmem:[#allocation2 + $0x588] ss:$16 sps:$4 sm:$0xff]   ;;  %v3023_v46 = vld [vmem:[#allocation2 + $0x5ec] ss:$16 sps:$4 sm:$0xff]  }
  0xce   :  { %2062 = vmatprep.subr.bf16.mxu0 %v3041_v47  ;;  %v3021_v47 = vld [vmem:[#allocation2 + $0x5e8] ss:$16 sps:$4 sm:$0xff]  }
  0xd0   :  { %1536 = vmatpush1.bf16.msra.mxu1 %v2955_v44  ;;  %v3017_v44 = vld [vmem:[#allocation2 + $0x5cc] ss:$16 sps:$4 sm:$0xff]  }
  0xd1   :  { %1537 = vmatprep.subr.bf16.mxu1 %v2960_v45  ;;  %2063 = vmatpush1.bf16.msra.mxu0 %v3039_v50  ;;  %v3015_v45 = vld [vmem:[#allocation2 + $0x5c8] ss:$16 sps:$4 sm:$0xff]  }
  0xd2   :  { %2064 = vmatprep.subr.bf16.mxu0 %v3044_v52 }
  0xd4   :  { %1538 = vmatpush1.bf16.msra.mxu1 %v2958_v48 }
  0xd5   :  { %1539 = vmatprep.subr.bf16.mxu1 %v2963_v49  ;;  %2065 = vmatpush1.bf16.msra.mxu0 %v3042_v55 }
  0xd6   :  { %2066 = vmatprep.subr.bf16.mxu0 %v3047_v56  ;;  %v3310_v56 = vld [vmem:[%s3398_s2] sm:$0xf] }
  0xd8   :  { %1540 = vmatpush1.bf16.msra.mxu1 %v2961_v53  ;;  %v261_v53 = vlaneseq }
  0xd9   :  { %1541 = vmatprep.subr.bf16.mxu1 %v2966_v54  ;;  %2067 = vmatpush1.bf16.msra.mxu0 %v3045_v59 }
  0xda   :  { %2068 = vmatprep.subr.bf16.mxu0 %v3050_v60  ;;  %v3304_v54 = vshrl.u32 %v261_v53, 7  ;;  %v3108_v53 = vld [vmem:[#allocation4 + $0x1c0] ss:$8 sps:$4 sm:$0xff]  }
  0xdc   :  { %1542 = vmatpush1.bf16.msra.mxu1 %v2964_v57  ;;  %v263_v55 = vsub.s32 0, %v3304_v54  ;;  %v267_v57 = vsub.s32 1, %v3304_v54 }
  0xdd   :  { %1543 = vmatprep.subr.bf16.mxu1 %v2969_v58  ;;  %2069 = vmatpush1.bf16.msra.mxu0 %v3048_v63 }
  0xde   :  { %2070 = vmatprep.subr.bf16.mxu0 %v3053_v0  ;;  %v268_v58 = vrot.slane %v3310_v56, %v267_v57 }
  0xe0   :  { %1544 = vmatpush1.bf16.msra.mxu1 %v2967_v61 }
  0xe1   :  { %1545 = vmatprep.subr.bf16.mxu1 %v2972_v62  ;;  %2071 = vmatpush1.bf16.msra.mxu0 %v3051_v3  ;;  %v3122_v3 = vld [vmem:[%s3401_s5 + $0x48] sm:$0xff]  }
  0xe2   :  { %2072 = vmatprep.subr.bf16.mxu0 %v3056_v6 }
  0xe4   :  { %1546 = vmatpush1.bf16.msra.mxu1 %v2970_v1  ;;  %v3120_v1 = vld [vmem:[%s3401_s5 + $0x40] sm:$0xff]  }
  0xe5   :  { %1558 = vmatprep.subr.bf16.mxu1 %v2975_v2  ;;  %2073 = vmatpush1.bf16.msra.mxu0 %v3054_v9  ;;  %v3121_v2 = vld [vmem:[%s3401_s5] sm:$0xff]  }
  0xe6   :  { %2074 = vmatprep.subr.bf16.mxu0 %v3059_v11 }
  0xe7   :  { %1548 = vmatmul.mubr.bf16.vlgmr.msra.gmra.mrb[4].mxu1 %v3280_v5  ;;  %v2982_v5 = vld [vmem:[#allocation2 + $0x468] ss:$16 sps:$4 sm:$0xff]  }
  0xe8   :  { %1559 = vmatpush1.bf16.msra.mxu1 %v2973_v7  ;;  %1590 = vmatprep.mubr.bf16.mxu1 %v3287_v34  ;;  %v3063_v34 = vld [vmem:[#allocation4 + $0xd0] ss:$8 sps:$4 sm:$0xff]  }
  0xe9   :  { %1560 = vmatprep.subr.bf16.mxu1 %v2978_v8  ;;  %2075 = vmatpush1.bf16.msra.mxu0 %v3057_v14 }
  0xea   :  { %2076 = vmatprep.subr.bf16.mxu0 %v3062_v15 }
  0xec   :  { %1561 = vmatpush1.bf16.msra.mxu1 %v2976_v12 }
  0xed   :  { %1562 = vmatprep.subr.bf16.mxu1 %v2981_v13  ;;  %2077 = vmatpush1.bf16.msra.mxu0 %v3060_v18  ;;  %v3123_v13 = vld [vmem:[%s3401_s5 + $0x8] sm:$0xff]  }
  0xee   :  { %2078 = vmatprep.subr.bf16.mxu0 %v3065_v19 }
  0xf0   :  { %1563 = vmatpush1.bf16.msra.mxu1 %v2979_v16  ;;  %v3124_v16 = vld [vmem:[%s3401_s5 + $0x50] sm:$0xff]  }
  0xf1   :  { %1564 = vmatprep.subr.bf16.mxu1 %v2984_v17  ;;  %2079 = vmatpush1.bf16.msra.mxu0 %v3063_v34 }
  0xf2   :  { %2080 = vmatprep.subr.bf16.mxu0 %v3068_v29  ;;  %v3078_v29 = vld [vmem:[#allocation4 + $0x120] ss:$8 sps:$4 sm:$0xff]  }
  0xf4   :  { %1565 = vmatpush1.bf16.msra.mxu1 %v2982_v5 }
  0xf5   :  { %1566 = vmatprep.subr.bf16.mxu1 %v2987_v20  ;;  %2081 = vmatpush1.bf16.msra.mxu0 %v3066_v31  ;;  %v3072_v20 = vld [vmem:[#allocation4 + $0x100] ss:$8 sps:$4 sm:$0xff]   ;;  %v3083_v31 = vld [vmem:[#allocation4 + $0x134] ss:$8 sps:$4 sm:$0xff]  }
  0xf6   :  { %2082 = vmatprep.subr.bf16.mxu0 %v3071_v33  ;;  %v3081_v33 = vld [vmem:[#allocation4 + $0x130] ss:$8 sps:$4 sm:$0xff]  }
  0xf8   :  { %1567 = vmatpush1.bf16.msra.mxu1 %v2985_v4  ;;  %v3125_v4 = vld [vmem:[%s3401_s5 + $0x10] sm:$0xff]  }
  0xf9   :  { %1568 = vmatprep.subr.bf16.mxu1 %v2990_v21  ;;  %2083 = vmatpush1.bf16.msra.mxu0 %v3069_v36  ;;  %v3077_v21 = vld [vmem:[#allocation4 + $0x114] ss:$8 sps:$4 sm:$0xff]   ;;  %v3084_v36 = vld [vmem:[#allocation4 + $0x140] ss:$8 sps:$4 sm:$0xff]  }
  0xfa   :  { %2095 = vmatprep.subr.bf16.mxu0 %v3074_v40  ;;  %v3090_v40 = vld [vmem:[#allocation4 + $0x160] ss:$8 sps:$4 sm:$0xff]  }
  0xfc   :  { %1569 = vmatpush1.bf16.msra.mxu1 %v2988_v22 }
  0xfd   :  { %1570 = vmatprep.subr.bf16.mxu1 %v2993_v23  ;;  %v3126_v23 = vld [vmem:[%s3401_s5 + $0x58] sm:$0xff]  }
 0x100   :  { %1571 = vmatpush1.bf16.msra.mxu1 %v2991_v24 }
 0x101   :  { %1572 = vmatprep.subr.bf16.mxu1 %v2996_v51 }
 0x104   :  { %1573 = vmatpush1.bf16.msra.mxu1 %v2994_v25  ;;  %v3075_v25 = vld [vmem:[#allocation4 + $0x110] ss:$8 sps:$4 sm:$0xff]  }
 0x105   :  { %1574 = vmatprep.subr.bf16.mxu1 %v2999_v26  ;;  %v3127_v26 = vld [vmem:[%s3401_s5 + $0x18] sm:$0xff]  }
 0x108   :  { %1575 = vmatpush1.bf16.msra.mxu1 %v2997_v27  ;;  %v3080_v27 = vld [vmem:[#allocation4 + $0x124] ss:$8 sps:$4 sm:$0xff]  }
 0x109   :  { %1576 = vmatprep.subr.bf16.mxu1 %v3002_v28  ;;  %v3128_v28 = vld [vmem:[%s3401_s5 + $0x60] sm:$0xff]  }
 0x10c   :  { %1577 = vmatpush1.bf16.msra.mxu1 %v3000_v30  ;;  %v3129_v30 = vld [vmem:[%s3401_s5 + $0x20] sm:$0xff]  }
 0x10d   :  { %1578 = vmatprep.subr.bf16.mxu1 %v3005_v32  ;;  %v3130_v32 = vld [vmem:[%s3401_s5 + $0x68] sm:$0xff]  }
 0x110   :  { %1579 = vmatpush1.bf16.msra.mxu1 %v3003_v35  ;;  %v3086_v35 = vld [vmem:[#allocation4 + $0x144] ss:$8 sps:$4 sm:$0xff]  }
 0x111   :  { %1580 = vmatprep.subr.bf16.mxu1 %v3008_v37  ;;  %v3089_v37 = vld [vmem:[#allocation4 + $0x154] ss:$8 sps:$4 sm:$0xff]  }
 0x114   :  { %1581 = vmatpush1.bf16.msra.mxu1 %v3006_v38  ;;  %v3087_v38 = vld [vmem:[#allocation4 + $0x150] ss:$8 sps:$4 sm:$0xff]  }
 0x115   :  { %1582 = vmatprep.subr.bf16.mxu1 %v3011_v39  ;;  %v3092_v39 = vld [vmem:[#allocation4 + $0x164] ss:$8 sps:$4 sm:$0xff]  }
 0x118   :  { %1583 = vmatpush1.bf16.msra.mxu1 %v3009_v41  ;;  %v3095_v41 = vld [vmem:[#allocation4 + $0x174] ss:$8 sps:$4 sm:$0xff]  }
 0x119   :  { %1584 = vmatprep.subr.bf16.mxu1 %v3014_v42  ;;  %v3093_v42 = vld [vmem:[#allocation4 + $0x170] ss:$8 sps:$4 sm:$0xff]  }
 0x11c   :  { %1585 = vmatpush1.bf16.msra.mxu1 %v3012_v43  ;;  %v3098_v43 = vld [vmem:[#allocation4 + $0x184] ss:$8 sps:$4 sm:$0xff]  }
 0x11d   :  { %1586 = vmatprep.subr.bf16.mxu1 %v3017_v44  ;;  %v3096_v44 = vld [vmem:[#allocation4 + $0x180] ss:$8 sps:$4 sm:$0xff]  }
 0x120   :  { %1587 = vmatpush1.bf16.msra.mxu1 %v3015_v45  ;;  %v3101_v45 = vld [vmem:[#allocation4 + $0x194] ss:$8 sps:$4 sm:$0xff]  }
 0x121   :  { %1588 = vmatprep.subr.bf16.mxu1 %v3023_v46  ;;  %v3099_v46 = vld [vmem:[#allocation4 + $0x190] ss:$8 sps:$4 sm:$0xff]  }
 0x124   :  { %1589 = vmatpush1.bf16.msra.mxu1 %v3021_v47  ;;  %v3104_v47 = vld [vmem:[#allocation4 + $0x1a4] ss:$8 sps:$4 sm:$0xff]  }
 0x125   :  { %2651 = vmatprep.subr.bf16.mxu1 %v3120_v1 }
 0x127   :  { %1591 = vmatmul.mubr.bf16.vlgmr.msra.gmra.mrb[4].mxu1 %v3293_v10  ;;  %v264_v10 = vrot.slane %v3310_v56, %v263_v55 }
 0x128   :  { %2652 = vmatpush3.bf16.msra.mxu1 %v3121_v2 }
 0x129   :  { %2653 = vmatprep.subr.bf16.mxu1 %v3122_v3 }
 0x12c   :  { %2654 = vmatpush3.bf16.msra.mxu1 %v3123_v13 }
 0x12d   :  { %2655 = vmatprep.subr.bf16.mxu1 %v3124_v16 }
 0x130   :  { %2656 = vmatpush3.bf16.msra.mxu1 %v3125_v4 }
 0x131   :  { %2657 = vmatprep.subr.bf16.mxu1 %v3126_v23  ;;  %v3134_v23 = vld [vmem:[%s3401_s5 + $0x78] sm:$0xff]  }
 0x134   :  { %2658 = vmatpush3.bf16.msra.mxu1 %v3127_v26 }
 0x135   :  { %2659 = vmatprep.subr.bf16.mxu1 %v3128_v28 }
 0x138   :  { %2660 = vmatpush3.bf16.msra.mxu1 %v3129_v30 }
 0x139   :  { %2661 = vmatprep.subr.bf16.mxu1 %v3130_v32 }
 0x13a   :  { %v1334_v48 = vpop.f32.mrb[0].mxu1 }
 0x13b   :  { %v1336_v49 = vpop.f32.mrb[1].mxu1  ;;  %v1335_v59 = vadd.f32 %v1334_v48, %v264_v10  ;;  %v3102_v48 = vld [vmem:[#allocation4 + $0x1a0] ss:$8 sps:$4 sm:$0xff]  }
 0x13c   :  { %v1338_v50 = vpop.f32.mrb[2].mxu1  ;;  %v1337_v60 = vadd.f32 %v1336_v49, %v268_v58  ;;  %v3107_v49 = vld [vmem:[#allocation4 + $0x1b4] ss:$8 sps:$4 sm:$0xff]  }
 0x13d   :  { %v1340_v52 = vpop.f32.mrb[3].mxu1  ;;  %v1339_v62 = vadd.f32 %v1338_v50, %v264_v10  ;;  %v3105_v50 = vld [vmem:[#allocation4 + $0x1b0] ss:$8 sps:$4 sm:$0xff]   ;;  %v3113_v10 = vld [vmem:[#allocation4 + $0x1d4] ss:$8 sps:$4 sm:$0xff]  }
 0x13e   :  { %v1341_v6 = vadd.f32 %v1340_v52, %v268_v58  ;;  %v3110_v52 = vld [vmem:[#allocation4 + $0x1c4] ss:$8 sps:$4 sm:$0xff]   ;;  %v3111_v58 = vld [vmem:[#allocation4 + $0x1d0] ss:$8 sps:$4 sm:$0xff]  }
 0x187   :  { %v1463_v61 = vpop.f32.mrb[0].mxu0 }
 0x188   :  { %v2674_v63 = vadd.f32 %v1463_v61, %v1335_v59  ;;  %v1465_v0 = vpop.f32.mrb[1].mxu0  ;;  %v3116_v59 = vld [vmem:[#allocation4 + $0x1e4] ss:$8 sps:$4 sm:$0xff]   ;;  %v3119_v61 = vld [vmem:[#allocation4 + $0x1f4] ss:$8 sps:$4 sm:$0xff]  }
 0x189   :  { %v2676_v7 = vadd.f32 %v1465_v0, %v1337_v60  ;;  %v1467_v8 = vpop.f32.mrb[2].mxu0  ;;  %v3114_v60 = vld [vmem:[#allocation4 + $0x1e0] ss:$8 sps:$4 sm:$0xff]   ;;  %v275_v0 = vsub.s32 3, %v3304_v54 }
 0x18a   :  { %v2678_v9 = vadd.f32 %v1467_v8, %v1339_v62  ;;  %v1469_v11 = vpop.f32.mrb[3].mxu0  ;;  %v1644_v14 = vmax.f32 %v2674_v63, 0.0  ;;  %v3117_v62 = vld [vmem:[#allocation4 + $0x1f0] ss:$8 sps:$4 sm:$0xff]   ;;  %v271_v63 = vsub.s32 2, %v3304_v54 }
 0x18b   :  { %v2680_v12 = vadd.f32 %v1469_v11, %v1341_v6  ;;  %v1645_v17 = vmax.f32 %v2676_v7, 0.0  ;;  %v276_v2 = vrot.slane %v3310_v56, %v275_v0  ;;  %v2625_v54 = vld [vmem:[%s3402_s6] ss:$0 sm:$0xff] }
 0x18c   :  { %v1648_v15 = vmax.f32 %v2678_v9, 0.0  ;;  %v272_v1 = vrot.slane %v3310_v56, %v271_v63 }
 0x18d   :  { %v1649_v18 = vmax.f32 %v2680_v12, 0.0 }
 0x18e   :  { %v1652_v19 = vpack.c.bf16 %v1648_v15, %v1644_v14 }
 0x18f   :  { %v1653_v5 = vpack.c.bf16 %v1649_v18, %v1645_v17  ;;  %v3334_v34 = vpop.f32.mrb[4].mxu0 }
 0x190   :  { %v3339_v22 = vpop.f32.mrb[5].mxu0 }
 0x191   :  { %2084 = vmatprep.mubr.bf16.mxu0 %v1653_v5  ;;  %v3344_v24 = vpop.f32.mrb[6].mxu0 }
 0x192   :  { %2085 = vmatmul.mubr.bf16.vlgmr.msra.gmra.mrb[8].mxu0 %v1652_v19  ;;  %v3346_v51 = vpop.f32.mrb[7].mxu0 }
 0x193   :  { %2096 = vmatpush1.bf16.msra.mxu0 %v3072_v20 }
 0x194   :  { %2097 = vmatprep.subr.bf16.mxu0 %v3077_v21  ;;  %v3132_v21 = vld [vmem:[%s3401_s5 + $0x70] sm:$0xff]  }
 0x197   :  { %2098 = vmatpush1.bf16.msra.mxu0 %v3075_v25 }
 0x198   :  { %2099 = vmatprep.subr.bf16.mxu0 %v3080_v27 }
 0x19b   :  { %2100 = vmatpush1.bf16.msra.mxu0 %v3078_v29 }
 0x19c   :  { %2101 = vmatprep.subr.bf16.mxu0 %v3083_v31 }
 0x19f   :  { %2102 = vmatpush1.bf16.msra.mxu0 %v3081_v33 }
 0x1a0   :  { %2103 = vmatprep.subr.bf16.mxu0 %v3086_v35 }
 0x1a3   :  { %2104 = vmatpush1.bf16.msra.mxu0 %v3084_v36 }
 0x1a4   :  { %2105 = vmatprep.subr.bf16.mxu0 %v3089_v37 }
 0x1a7   :  { %2106 = vmatpush1.bf16.msra.mxu0 %v3087_v38 }
 0x1a8   :  { %2107 = vmatprep.subr.bf16.mxu0 %v3092_v39 }
 0x1ab   :  { %2108 = vmatpush1.bf16.msra.mxu0 %v3090_v40 }
 0x1ac   :  { %2109 = vmatprep.subr.bf16.mxu0 %v3095_v41 }
 0x1af   :  { %2110 = vmatpush1.bf16.msra.mxu0 %v3093_v42 }
 0x1b0   :  { %2111 = vmatprep.subr.bf16.mxu0 %v3098_v43 }
 0x1b3   :  { %2112 = vmatpush1.bf16.msra.mxu0 %v3096_v44 }
 0x1b4   :  { %2113 = vmatprep.subr.bf16.mxu0 %v3101_v45 }
 0x1b7   :  { %2114 = vmatpush1.bf16.msra.mxu0 %v3099_v46 }
 0x1b8   :  { %2115 = vmatprep.subr.bf16.mxu0 %v3104_v47 }
 0x1bb   :  { %2116 = vmatpush1.bf16.msra.mxu0 %v3102_v48 }
 0x1bc   :  { %2117 = vmatprep.subr.bf16.mxu0 %v3107_v49 }
 0x1bf   :  { %2118 = vmatpush1.bf16.msra.mxu0 %v3105_v50 }
 0x1c0   :  { %2119 = vmatprep.subr.bf16.mxu0 %v3110_v52 }
 0x1c3   :  { %2120 = vmatpush1.bf16.msra.mxu0 %v3108_v53 }
 0x1c4   :  { %2121 = vmatprep.subr.bf16.mxu0 %v3113_v10 }
 0x1c7   :  { %2122 = vmatpush1.bf16.msra.mxu0 %v3111_v58 }
 0x1c8   :  { %2123 = vmatprep.subr.bf16.mxu0 %v3116_v59 }
 0x1cb   :  { %2124 = vmatpush1.bf16.msra.mxu0 %v3114_v60 }
 0x1cc   :  { %2125 = vmatprep.subr.bf16.mxu0 %v3119_v61 }
 0x1cf   :  { %2126 = vmatpush1.bf16.msra.mxu0 %v3117_v62 }
 0x1fa   :  { %v1592_v3 = vpop.f32.mrb[4].mxu1 }
 0x1fb   :  { %v2681_v6 = vadd.f32 %v1592_v3, %v272_v1  ;;  %v1594_v7 = vpop.f32.mrb[5].mxu1 }
 0x1fc   :  { %v2683_v8 = vadd.f32 %v1594_v7, %v276_v2  ;;  %v1596_v9 = vpop.f32.mrb[6].mxu1 }
 0x1fd   :  { %v2682_v11 = vadd.f32 %v2681_v6, %v3334_v34  ;;  %v2685_v12 = vadd.f32 %v1596_v9, %v272_v1  ;;  %v1598_v13 = vpop.f32.mrb[7].mxu1  ;;  %v3131_v34 = vld [vmem:[%s3401_s5 + $0x28] sm:$0xff]  }
 0x1fe   :  { %v2684_v14 = vadd.f32 %v2683_v8, %v3339_v22  ;;  %v2687_v15 = vadd.f32 %v1598_v13, %v276_v2  ;;  %2662 = vmatpush3.bf16.msra.mxu1 %v3131_v34  ;;  %v3133_v22 = vld [vmem:[%s3401_s5 + $0x30] sm:$0xff]  }
 0x1ff   :  { %v2686_v16 = vadd.f32 %v2685_v12, %v3344_v24  ;;  %v1646_v18 = vmax.f32 %v2682_v11, 0.0  ;;  %2663 = vmatprep.subr.bf16.mxu1 %v3132_v21  ;;  %v3135_v24 = vld [vmem:[%s3401_s5 + $0x38] sm:$0xff]  }
 0x200   :  { %v2688_v17 = vadd.f32 %v2687_v15, %v3346_v51  ;;  %v1647_v5 = vmax.f32 %v2684_v14, 0.0  ;;  %v1720_v51 = vld [vmem:[%s3400_s4] sm:$0x3] }
 0x201   :  { %v1650_v19 = vmax.f32 %v2686_v16, 0.0  ;;  %v1725_v25 = vrot.slane %v1720_v51, %v263_v55  ;;  %v1729_v26 = vrot.slane %v1720_v51, %v267_v57 }
 0x202   :  { %v1651_v56 = vmax.f32 %v2688_v17, 0.0  ;;  %2664 = vmatpush3.bf16.msra.mxu1 %v3133_v22 }
 0x203   :  { %v1654_v20 = vpack.c.bf16 %v1650_v19, %v1646_v18  ;;  %2665 = vmatprep.subr.bf16.mxu1 %v3134_v23 }
 0x204   :  { %v1655_v4 = vpack.c.bf16 %v1651_v56, %v1647_v5 }
 0x206   :  { %2127 = vmatprep.mubr.bf16.mxu0 %v1655_v4  ;;  %2666 = vmatpush3.bf16.msra.mxu1 %v3135_v24 }
 0x207   :  { %2128 = vmatmul.mubr.bf16.vlgmr.msra.gmra.mrb[8].mxu0 %v1654_v20 }
 0x2da   :  { %v2129_v27 = vpop.f32.mrb[8].mxu0 }
 0x2db   :  { %v2689_v28 = vadd.f32 %v2129_v27, %v1725_v25  ;;  %v2131_v29 = vpop.f32.mrb[9].mxu0 }
 0x2dc   :  { %v2690_v30 = vadd.f32 %v2131_v29, %v1729_v26  ;;  %v2133_v31 = vpop.f32.mrb[10].mxu0 }
 0x2dd   :  { %v2691_v32 = vadd.f32 %v2133_v31, %v1725_v25  ;;  %v2135_v33 = vpop.f32.mrb[11].mxu0  ;;  %v2138_v36 = vmax.f32 %v2689_v28, 0.0 }
 0x2de   :  { %v2692_v35 = vadd.f32 %v2135_v33, %v1729_v26  ;;  %v2139_v38 = vmax.f32 %v2690_v30, 0.0 }
 0x2df   :  { %v2140_v37 = vmax.f32 %v2691_v32, 0.0 }
 0x2e0   :  { %v2141_v39 = vmax.f32 %v2692_v35, 0.0 }
 0x2e1   :  { %v2142_v40 = vpack.c.bf16 %v2140_v37, %v2138_v36 }
 0x2e2   :  { %v2143_v41 = vpack.c.bf16 %v2141_v39, %v2139_v38 }
 0x2e4   :  { %2311 = vmatprep.mubr.bf16.mxu1 %v2143_v41 }
 0x2e5   :  { %2312 = vmatmul.mubr.bf16.vlgmr.msra.gmra.mrb[8].mxu1 %v2142_v40 }
 0x3b8   :  { %v2667_v55 = vpop.f32.mrb[8].mxu1 }
 0x3b9   :  { %v2668_v42 = vpop.f32.mrb[9].mxu1 }
 0x3ba   :  { %v2669_v57 = vadd.f32 %v2668_v42, %v2667_v55  ;;  %v2670_v43 = vpop.f32.mrb[10].mxu1 }
 0x3bb   :  { %v2671_v44 = vpop.f32.mrb[11].mxu1 }
 0x3bc   :  { %v2672_v45 = vadd.f32 %v2671_v44, %v2670_v43  ;;  %v2314_v46 = vadd.f32 %v2669_v57, %v2625_v54 }
 0x3be   :  { %2320 = vmax.xlane.f32.xlu0 %v2314_v46  ;;  %v2317_v47 = vadd.f32 %v2672_v45, %v2625_v54 }
 0x3c2   :  { %2322 = vmax.xlane.f32.xlu0 %v2317_v47 }
 0x44b   :  { %v2321_v48 = vpop.xlane.xlu0 %2320 }
 0x44c   :  { %v2324_v49 = vsub.f32 %v2314_v46, %v2321_v48 }
 0x44e   :  { %v2326_v50 = vmul.f32 1.442695, %v2324_v49 }
 0x44f   :  { %v2323_v52 = vpop.xlane.xlu0 %2322 }
 0x450   :  { %v2325_v53 = vsub.f32 %v2317_v47, %v2323_v52  ;;  %3136 = vpow2.f32 %v2326_v50 }
 0x452   :  { %v2328_v10 = vmul.f32 1.442695, %v2325_v53 }
 0x454   :  { %3138 = vpow2.f32 %v2328_v10 }
 0x45a   :  { %v3137_v58 = vpop.eup %3136 }
 0x45b   :  { %2330 = vadd.xlane.f32.xlu1 %v3137_v58 }
 0x45e   :  { %v3139_v59 = vpop.eup %3138 }
 0x45f   :  { %2332 = vadd.xlane.f32.xlu1 %v3139_v59 }
 0x4e8   :  { %v2331_v60 = vpop.xlane.xlu1 %2330 }
 0x4e9   :  { %3140 = vlog2.f32 %v2331_v60 }
 0x4ec   :  { %v2333_v61 = vpop.xlane.xlu1 %2332 }
 0x4ed   :  { %3142 = vlog2.f32 %v2333_v61 }
 0x4f3   :  { %v3141_v62 = vpop.eup %3140 }
 0x4f4   :  { %v2335_v63 = vmul.f32 0.6931472, %v3141_v62 }
 0x4f6   :  { %v2338_v2 = vsub.f32 %v2324_v49, %v2335_v63 }
 0x4f7   :  { %v3143_v0 = vpop.eup %3142 }
 0x4f8   :  { %v2337_v1 = vmul.f32 0.6931472, %v3143_v0 }
 0x4fa   :  { %v2339_v3 = vsub.f32 %v2325_v53, %v2337_v1 }
 0x4fc   :  { %v2649_v6 = vpack.c.bf16 %v2339_v3, %v2338_v2 }
 0x4fe   :  { %2650 = vst [vmem:[%s3403_s7] sm:$0xff] %v2649_v6  }
 0x4ff   :  { %2354 = vsyncpa [#allocation3], 1 }
 0x500   :  { %2355 = vsyncpa [#allocation5], 1 }

</bundles_post_ra>
